<compile_context>
chip_gen: v7x
topology: tpu7x:2x2x1
jax: 0.10.0
libtpu: 0.0.40
codegen_flags: <defaults>
</compile_context>

<pallas_src>
import functools

import jax
import jax.numpy as jnp
from jax import lax
from jax.experimental import pallas as pl
from jax.experimental.pallas import tpu as pltpu


def _round_up(a, b):
    return ((a + b - 1) // b) * b


def _cdiv(a, b):
    return (a + b - 1) // b


def _static_int_pow(x, p):
    """x ** p for a static python int p >= 1, via exponentiation-by-squaring."""
    assert p >= 1
    result = None
    base = x
    while p > 0:
        if p & 1:
            result = base if result is None else result * base
        p >>= 1
        if p:
            base = base * base
    return result


def _device_info():
    """(vmem_cap_bytes, tensorcores_per_chip, is_v5e) from the device kind."""
    try:
        kind = jax.devices()[0].device_kind.lower()
    except Exception:  # defensive: never let the query break the wrapper
        kind = ""
    is_v7 = "v7" in kind
    is_v5e = ("v5 lite" in kind) or ("v5e" in kind) or ("v5litepod" in kind)
    # v7x: 64 MiB VMEM per TensorCore, 2 TCs per chip -> cap well below 64 MiB
    # to leave room for compiler-internal scratch.  v5e/v6e (and v4/v5p) have
    # 128 MiB per core, so allow bigger tiles there.
    vmem_cap = (48 << 20) if is_v7 else (100 << 20)
    num_tc = 2 if is_v7 else 1
    return vmem_cap, num_tc, is_v5e


def _poly_kernel(s0_ref, sp_ref, x1_ref, x2_ref, o_ref, *, deg, num_k):
    """One (tm, tn) output tile; accumulate over the feat (k) grid axis."""
    # x1_ref: (tm, tk), x2_ref: (tn, tk).  Contract the trailing (feature) dim
    # of BOTH operands so the MXU consumes X2 in its natural (m, feat) HBM
    # layout -- no wrapper-side transpose pass, no per-tile relayout.
    partial = lax.dot_general(
        x1_ref[...], x2_ref[...],
        dimension_numbers=(((1,), (1,)), ((), ())),
        preferred_element_type=jnp.float32)

    def epilogue(acc):
        s0sq = s0_ref[0] * s0_ref[0]      # hoisted SMEM scalars
        spsq = sp_ref[0] * sp_ref[0]
        return _static_int_pow(s0sq + spsq * acc, deg)

    if num_k == 1:
        # Single contraction step: straight matmul + epilogue, no accumulator
        # read-modify-write traffic at all.
        o_ref[...] = epilogue(partial)
    else:
        k = pl.program_id(2)

        @pl.when(k == 0)
        def _():                           # first step writes directly (no zero-init pass)
            o_ref[...] = partial

        @pl.when(jnp.logical_and(k > 0, k < num_k - 1))
        def _():
            o_ref[...] += partial

        @pl.when(k == num_k - 1)
        def _():                           # fold the last partial into the epilogue
            o_ref[...] = epilogue(o_ref[...] + partial)


def polynomial_kernel(x1, x2, s0, sp, deg, *, tm=None, tn=None, tk=None,
                      use_bf16=False):
    """Pallas TPU implementation of PolynomialKernel.forward.

    x1: (n, feat), x2: (m, feat), s0/sp: (1,) f32, deg: python int >= 1.
    Returns K: (n, m) f32 = (s0^2 + sp^2 * x1 @ x2.T) ** deg.
    """
    assert isinstance(deg, int) and deg >= 1
    n, feat = x1.shape
    m, feat2 = x2.shape
    assert feat == feat2

    s0 = jnp.asarray(s0, jnp.float32).reshape(1)
    sp = jnp.asarray(sp, jnp.float32).reshape(1)

    vmem_cap, num_tc, is_v5e = _device_info()

    in_dtype = jnp.bfloat16 if use_bf16 else jnp.float32
    bytes_in = jnp.dtype(in_dtype).itemsize
    row_align = 16 if use_bf16 else 8        # bf16 packs two rows per sublane

    # --- tile selection (MXU-friendly, clamped for small problems) ------------
    if tm is None:
        tm = min(512, _round_up(n, row_align))
        if use_bf16 and n >= 1024 and m >= 1024:
            tm = 1024
    if tn is None:
        tn = min(1024, _round_up(m, 128))     # lane-dense output columns
    if tk is None:
        # v5e: fewer k passes per output tile relieve its single vector-store
        # slot and lowest HBM BW; it also has the 128 MiB VMEM to pay for it.
        tk_cap = 1024 if (is_v5e and feat > 512) else 512
        tk = min(tk_cap, _round_up(feat, 128))

    # --- feed both TensorCores on 2-TC parts (v7x); no-op on v5e/v6e ----------
    if num_tc >= 2 and _cdiv(n, tm) * _cdiv(m, tn) < num_tc:
        tm_half = max(row_align, _round_up(tm // 2, row_align))
        if tm_half < tm and _cdiv(n, tm_half) >= 2:
            tm = tm_half                      # prefer row split: keeps tn lane-dense
        elif tn >= 256:
            tn = _round_up(tn // 2, 128)

    # --- make sure the double-buffered working set fits the VMEM budget -------
    def _vmem_need(tm_, tn_, tk_):
        return (2 * (tm_ * tk_ + tn_ * tk_) * bytes_in   # double-buffered inputs
                + 2 * tm_ * tn_ * 4                      # resident f32 output tile
                + (2 << 20))                             # headroom / internal scratch
    while _vmem_need(tm, tn, tk) > vmem_cap:
        if tk > 128:
            tk = max(128, _round_up(tk // 2, 128))
        elif tn > 128:
            tn = max(128, _round_up(tn // 2, 128))
        elif tm > row_align:
            tm = max(row_align, _round_up(tm // 2, row_align))
        else:
            break

    # --- pad to tile multiples (zero-padding is exact for this kernel) --------
    n_pad = _round_up(n, tm)
    m_pad = _round_up(m, tn)
    k_pad = _round_up(feat, tk)

    x1p = jnp.asarray(x1, in_dtype)
    x2p = jnp.asarray(x2, in_dtype)           # kept (m, feat): no HBM transpose pass
    if (n_pad, k_pad) != (n, feat):
        x1p = jnp.pad(x1p, ((0, n_pad - n), (0, k_pad - feat)))
    if (m_pad, k_pad) != (m, feat):
        x2p = jnp.pad(x2p, ((0, m_pad - m), (0, k_pad - feat)))

    num_k = k_pad // tk
    grid = (n_pad // tm, m_pad // tn, num_k)

    vmem_limit = int(min(max(_vmem_need(tm, tn, tk), 32 << 20), vmem_cap))

    kernel = functools.partial(_poly_kernel, deg=deg, num_k=num_k)

    out = pl.pallas_call(
        kernel,
        out_shape=jax.ShapeDtypeStruct((n_pad, m_pad), jnp.float32),
        grid_spec=pltpu.PrefetchScalarGridSpec(
            num_scalar_prefetch=0,
            grid=grid,
            in_specs=[
                # hyperparameters live in SMEM (scalars)
                pl.BlockSpec(memory_space=pltpu.MemorySpace.SMEM),
                pl.BlockSpec(memory_space=pltpu.MemorySpace.SMEM),
                # X1 tile: (tm, tk)
                pl.BlockSpec((tm, tk), lambda i, j, k: (i, k)),
                # X2 tile: (tn, tk) -- contracted on its trailing dim in-kernel
                pl.BlockSpec((tn, tk), lambda i, j, k: (j, k)),
            ],
            # Output block index ignores k -> VMEM-resident accumulator.
            out_specs=pl.BlockSpec((tm, tn), lambda i, j, k: (i, j)),
        ),
        compiler_params=pltpu.CompilerParams(
            dimension_semantics=("parallel", "parallel", "arbitrary"),
            vmem_limit_bytes=vmem_limit),
    )(s0, sp, x1p, x2p)

    if (n_pad, m_pad) != (n, m):
        out = out[:n, :m]
    return out


if __name__ == "__main__":
    # Deterministic parameter init (matches PolynomialKernel.__init__ shapes:
    # s0 and sp are single-element parameters; degree d is a Python int).
    deg = 3
    s0 = jnp.array([1.0], dtype=jnp.float32)
    sp = jnp.array([1.0], dtype=jnp.float32)

    key = jax.random.PRNGKey(0)
    k1, k2, k3, k4, k5, k6 = jax.random.split(key, 6)

    # Case 1: nicely shaped problem, f32 path.
    n, m, feat = 128, 256, 128
    x1 = jax.random.normal(k1, (n, feat), dtype=jnp.float32)
    x2 = jax.random.normal(k2, (m, feat), dtype=jnp.float32)
    out = jax.block_until_ready(polynomial_kernel(x1, x2, s0, sp, deg))
    ref = (s0[0] ** 2 + sp[0] ** 2 * (x1 @ x2.T)) ** deg
    assert out.shape == (n, m)
    assert jnp.allclose(out, ref, rtol=1e-4, atol=1e-3), "mismatch vs reference (case 1)"

    # Case 2: ragged shapes (exercise the padding / slicing path), f32.
    n2, m2, feat2 = 100, 200, 96
    x1b = jax.random.normal(k3, (n2, feat2), dtype=jnp.float32)
    x2b = jax.random.normal(k4, (m2, feat2), dtype=jnp.float32)
    out2 = jax.block_until_ready(polynomial_kernel(x1b, x2b, s0, sp, deg))
    ref2 = (s0[0] ** 2 + sp[0] ** 2 * (x1b @ x2b.T)) ** deg
    assert out2.shape == (n2, m2)
    assert jnp.allclose(out2, ref2, rtol=1e-4, atol=1e-3), "mismatch vs reference (case 2)"

    # Case 3: multi-step contraction (num_k > 1) via an explicit small tk,
    # exercising the write-then-accumulate-then-epilogue path.
    n3, m3, feat3 = 64, 128, 256
    x1c = jax.random.normal(k5, (n3, feat3), dtype=jnp.float32)
    x2c = jax.random.normal(k6, (m3, feat3), dtype=jnp.float32)
    out3 = jax.block_until_ready(polynomial_kernel(x1c, x2c, s0, sp, deg, tk=128))
    ref3 = (s0[0] ** 2 + sp[0] ** 2 * (x1c @ x2c.T)) ** deg
    assert out3.shape == (n3, m3)
    assert jnp.allclose(out3, ref3, rtol=1e-4, atol=1e-3), "mismatch vs reference (case 3)"

    # Case 4: bf16 fast path (f32 accumulation).  Compare against an f32
    # reference computed from bf16-rounded inputs: the input rounding is the
    # semantic difference of this mode, the accumulation stays f32.
    x1d = x1.astype(jnp.bfloat16).astype(jnp.float32)
    x2d = x2.astype(jnp.bfloat16).astype(jnp.float32)
    out4 = jax.block_until_ready(
        polynomial_kernel(x1, x2, s0, sp, deg, use_bf16=True))
    ref4 = (s0[0] ** 2 + sp[0] ** 2
            * jnp.dot(x1d, x2d.T, precision=jax.lax.Precision.HIGHEST)) ** deg
    assert out4.shape == (n, m)
    assert jnp.allclose(out4, ref4, rtol=1e-3, atol=5e-1), "mismatch vs reference (case 4)"

    print("KERNEL_OK")
</pallas_src>

<mosaic_0001>
module attributes {stable_mosaic.version = 11 : i64} {
  func.func @_poly_kernel(%arg0: i32, %arg1: i32, %arg2: i32, %arg3: memref<1xf32, #tpu.memory_space<smem>>, %arg4: memref<1xf32, #tpu.memory_space<smem>>, %arg5: memref<128x128xf32, #tpu.memory_space<vmem>>, %arg6: memref<256x128xf32, #tpu.memory_space<vmem>>, %arg7: memref<128x256xf32, #tpu.memory_space<vmem>>) attributes {dimension_semantics = [#tpu.dimension_semantics<parallel>, #tpu.dimension_semantics<parallel>, #tpu.dimension_semantics<arbitrary>], iteration_bounds = array<i64: 1, 1, 1>, scalar_prefetch = 0 : i64, scratch_operands = 0 : i64, tpu.core_type = #tpu.core_type<tc>, window_params = [{transform_indices = @transform_0, window_bounds = array<i64: 1>}, {transform_indices = @transform_1, window_bounds = array<i64: 1>}, {transform_indices = @transform_2, window_bounds = array<i64: 128, 128>}, {transform_indices = @transform_3, window_bounds = array<i64: 256, 128>}, {transform_indices = @transform_4, window_bounds = array<i64: 128, 256>}]} {
    %c0 = arith.constant 0 : index
    %c0_0 = arith.constant 0 : index
    %0 = vector.load %arg5[%c0, %c0_0] : memref<128x128xf32, #tpu.memory_space<vmem>>, vector<128x128xf32>
    %c0_1 = arith.constant 0 : index
    %c0_2 = arith.constant 0 : index
    %1 = vector.load %arg6[%c0_1, %c0_2] : memref<256x128xf32, #tpu.memory_space<vmem>>, vector<256x128xf32>
    %cst = arith.constant dense<0.000000e+00> : vector<128x256xf32>
    %2 = tpu.matmul %0, %1, %cst {dimension_numbers = #tpu.dot_dimension_numbers<[1], [1], [0], [0], [0, 0, 1, 0], [], []>} : vector<128x128xf32>, vector<256x128xf32>, vector<128x256xf32> -> vector<128x256xf32>
    %c0_3 = arith.constant 0 : index
    %3 = memref.load %arg3[%c0_3] : memref<1xf32, #tpu.memory_space<smem>>
    %c0_4 = arith.constant 0 : index
    %4 = memref.load %arg3[%c0_4] : memref<1xf32, #tpu.memory_space<smem>>
    %5 = arith.mulf %3, %4 : f32
    %c0_5 = arith.constant 0 : index
    %6 = memref.load %arg4[%c0_5] : memref<1xf32, #tpu.memory_space<smem>>
    %c0_6 = arith.constant 0 : index
    %7 = memref.load %arg4[%c0_6] : memref<1xf32, #tpu.memory_space<smem>>
    %8 = arith.mulf %6, %7 : f32
    %9 = vector.broadcast %8 : f32 to vector<128x256xf32>
    %10 = arith.mulf %9, %2 : vector<128x256xf32>
    %11 = vector.broadcast %5 : f32 to vector<128x256xf32>
    %12 = arith.addf %11, %10 : vector<128x256xf32>
    %13 = arith.mulf %12, %12 : vector<128x256xf32>
    %14 = arith.mulf %12, %13 : vector<128x256xf32>
    %c0_7 = arith.constant 0 : index
    %c0_8 = arith.constant 0 : index
    %15 = vector.load %arg7[%c0_7, %c0_8] : memref<128x256xf32, #tpu.memory_space<vmem>>, vector<128x256xf32>
    tpu.vector_store %arg7[%c0_7, %c0_8], %14 {strides = array<i32>} : memref<128x256xf32, #tpu.memory_space<vmem>>, vector<128x256xf32>,
    return
  }
  func.func @transform_0(%arg0: i32, %arg1: i32, %arg2: i32) -> i32 {
    %c0_i32 = arith.constant 0 : i32
    %c0_i32_0 = arith.constant 0 : i32
    return %c0_i32 : i32
  }
  func.func @transform_1(%arg0: i32, %arg1: i32, %arg2: i32) -> i32 {
    %c0_i32 = arith.constant 0 : i32
    %c0_i32_0 = arith.constant 0 : i32
    return %c0_i32 : i32
  }
  func.func @transform_2(%arg0: i32, %arg1: i32, %arg2: i32) -> (i32, i32) {
    %c0_i32 = arith.constant 0 : i32
    return %arg0, %arg2 : i32, i32
  }
  func.func @transform_3(%arg0: i32, %arg1: i32, %arg2: i32) -> (i32, i32) {
    %c0_i32 = arith.constant 0 : i32
    return %arg1, %arg2 : i32, i32
  }
  func.func @transform_4(%arg0: i32, %arg1: i32, %arg2: i32) -> (i32, i32) {
    %c0_i32 = arith.constant 0 : i32
    return %arg0, %arg1 : i32, i32
  }
}

</mosaic_0001>

<bundles_post_ra>
// kernel: tpu_custom_call.1
= control target key start
LH: loop header
LB: loop body
LE: loop exit
PB: predicated region body
PF: predicated region fallthrough
CT: control target
= control target key end

     0   :  { %11 = vsyncpa [#allocation5], 0  ;;  %s784_s0 = inlined_call_operand.<no memory space> [shape: f32[1], index: 0, kind: input, shape index: {}]   ;;  %s785_s1 = inlined_call_operand.<no memory space> [shape: f32[1], index: 1, kind: input, shape index: {}]   ;;  %s786_s2 = inlined_call_operand.hbm [shape: f32[128,128], index: 2, kind: input, shape index: {}]   ;;  %s787_s3 = inlined_call_operand.hbm [shape: f32[256,128], index: 3, kind: input, shape index: {}]   ;;  %s788_s4 = inlined_call_operand.hbm [shape: f32[128,256], index: 4, kind: output, shape index: {}]  }
   0x1   :  { %12 = vsyncpa [#allocation8], 0 }
   0x2   :  { %13 = vsyncpa [#allocation6], 0  ;;  %s632_s15 = smov [#allocation4]   ;;  %s560_s19 = scalar_lea.hbm %s786_s2, 2048 }
   0x3   :  { %s23_s16 = sshll.u32 %s632_s15, 4  ;;  %p561_p0 = scmp.ne.s32.totalorder %s786_s2, %s560_s19  ;;  %s24_s16 = int_to_ptr.vmem [resolvable:$true] %s23_s16 }
   0x4   :  { %p564_p1 = scmp.lt.u32.totalorder %s560_s19, %s786_s2 }
   0x6   :  { %p566_p2 = pnand %p564_p1, %p561_p0 }
   0x8   :  { %569 = shalt.err (!%p566_p2)
}
   0x9   :  { %s570_s24 = scalar_lea.vmem %s24_s16, 2048  ;;  %p575_p4 = scmp.lt.s32.totalorder %s24_s16, %s24_s16 }
   0xa   :  { %p571_p3 = scmp.ne.s32.totalorder %s24_s16, %s570_s24  ;;  %p576_p5 = scmp.lt.s32.totalorder %s570_s24, %s570_s24 }
   0xc   :  { %p577_p6 = por %p576_p5, %p575_p4 }
   0xe   :  { %p578_p7 = pnand %p577_p6, %p571_p3 }
  0x10   :  { %581 = shalt.err (!%p578_p7)
}
  0x11   :  { %s633_s25 = smov 128   ;;  %s634_s26 = smov 8  }
  0x12   :  { %29 = dma.hbm_to_vmem [thread:$0]  %s786_s2, 2048, %s24_s16, [#allocation5], %s633_s25, %s633_s25, %s634_s26  }
  0x13   :  { %s635_s29 = smov [#allocation7]   ;;  %s582_s7 = scalar_lea.hbm %s787_s3, 4096 }
  0x14   :  { %s35_s30 = sshll.u32 %s635_s29, 4  ;;  %p583_p8 = scmp.ne.s32.totalorder %s787_s3, %s582_s7  ;;  %s36_s30 = int_to_ptr.vmem [resolvable:$true] %s35_s30 }
  0x15   :  { %p586_p9 = scmp.lt.u32.totalorder %s582_s7, %s787_s3 }
  0x17   :  { %p588_p10 = pnand %p586_p9, %p583_p8 }
  0x19   :  { %591 = shalt.err (!%p588_p10)
}
  0x1a   :  { %s592_s12 = scalar_lea.vmem %s36_s30, 4096  ;;  %p597_p12 = scmp.lt.s32.totalorder %s36_s30, %s36_s30 }
  0x1b   :  { %p593_p11 = scmp.ne.s32.totalorder %s36_s30, %s592_s12  ;;  %p598_p13 = scmp.lt.s32.totalorder %s592_s12, %s592_s12 }
  0x1d   :  { %p599_p0 = por %p598_p13, %p597_p12 }
  0x1f   :  { %p600_p1 = pnand %p599_p0, %p593_p11 }
  0x21   :  { %603 = shalt.err (!%p600_p1)
}
  0x22   :  { %41 = dma.hbm_to_vmem [thread:$0]  %s787_s3, 4096, %s36_s30, [#allocation8], %s633_s25, %s633_s25, %s634_s26  }
  0x23   :  { %626 = dma.done.wait [#allocation5], 2048  }
  0x24   :  { %627 = vsyncadd [#allocation5], 4294965248 }
  0x25   :  { %628 = dma.done.wait [#allocation8], 4096  }
  0x26   :  { %629 = vsyncadd [#allocation8], 4294963200  ;;  %v80_v0 = vld [vmem:[#allocation7 + $0x80] sm:$0xff]  ;;  %v81_v1 = vld [vmem:[#allocation7 + $0x88] sm:$0xff]  ;;  %s260_s15 = smul.f32 %s785_s1, %s785_s1 }
  0x27   :  { %v64_v2 = vld [vmem:[#allocation7] sm:$0xff]  ;;  %v505_v3 = vpack.c.bf16 %v81_v1, %v80_v0  ;;  %v65_v4 = vld [vmem:[#allocation7 + $0x8] sm:$0xff]  ;;  %v82_v5 = vld [vmem:[#allocation7 + $0x90] sm:$0xff]  ;;  %s258_s18 = smul.f32 %s784_s0, %s784_s0  ;;  %s636_s0 = smov [#allocation9]  }
  0x28   :  { %v83_v6 = vld [vmem:[#allocation7 + $0x98] sm:$0xff]  ;;  %v507_v7 = vpack.c.bf16 %v65_v4, %v64_v2  ;;  %v66_v9 = vld [vmem:[#allocation7 + $0x10] sm:$0xff]  ;;  %v84_v11 = vld [vmem:[#allocation7 + $0xa0] sm:$0xff]  ;;  %v704_v0 = vstv %s260_s15  ;;  %s428_s1 = sshll.u32 %s636_s0, 4  ;;  %s429_s1 = int_to_ptr.vmem [resolvable:$true] %s428_s1 }
  0x29   :  { %v509_v8 = vpack.c.bf16 %v83_v6, %v82_v5  ;;  %506 = vmatprep.subr.bf16.mxu0 %v505_v3  ;;  %537 = vmatprep.subr.bf16.mxu1 %v505_v3  ;;  %v67_v10 = vld [vmem:[#allocation7 + $0x18] sm:$0xff]  ;;  %v85_v12 = vld [vmem:[#allocation7 + $0xa8] sm:$0xff]  ;;  %v688_v15 = vld [vmem:[#allocation4] sm:$0xff]  ;;  %v706_v2 = vstv %s258_s18  ;;  %s604_s19 = scalar_lea.vmem %s429_s1, 4096  ;;  %p609_p3 = scmp.lt.s32.totalorder %s429_s1, %s429_s1 }
  0x2a   :  { %508 = vmatpush3.bf16.xpose.msra.mxu0 %v507_v7  ;;  %545 = vmatpush3.bf16.xpose.msra.mxu1 %v507_v7  ;;  %v511_v13 = vpack.c.bf16 %v67_v10, %v66_v9  ;;  %v513_v14 = vpack.c.bf16 %v85_v12, %v84_v11  ;;  %v691_v16 = vld [vmem:[#allocation4 + $0x40] sm:$0xff]  ;;  %v69_v18 = vld [vmem:[#allocation7 + $0x28] sm:$0xff]  ;;  %v86_v19 = vld [vmem:[#allocation7 + $0xb0] sm:$0xff]  ;;  %p605_p2 = scmp.ne.s32.totalorder %s429_s1, %s604_s19  ;;  %p610_p4 = scmp.lt.s32.totalorder %s604_s19, %s604_s19 }
  0x2b   :  { %510 = vmatprep.subr.bf16.mxu0 %v509_v8  ;;  %538 = vmatprep.subr.bf16.mxu1 %v509_v8  ;;  %v68_v17 = vld [vmem:[#allocation7 + $0x20] sm:$0xff]  ;;  %v87_v20 = vld [vmem:[#allocation7 + $0xb8] sm:$0xff]  ;;  %v70_v23 = vld [vmem:[#allocation7 + $0x30] sm:$0xff] }
  0x2c   :  { %473 = vmatprep.mubr.f32.mxu0 %v688_v15  ;;  %489 = vmatprep.mubr.f32.mxu1 %v691_v16  ;;  %v515_v21 = vpack.c.bf16 %v69_v18, %v68_v17  ;;  %v517_v22 = vpack.c.bf16 %v87_v20, %v86_v19  ;;  %v71_v24 = vld [vmem:[#allocation7 + $0x38] sm:$0xff]  ;;  %v88_v25 = vld [vmem:[#allocation7 + $0xc0] sm:$0xff]  ;;  %v89_v26 = vld [vmem:[#allocation7 + $0xc8] sm:$0xff]  ;;  %p611_p5 = por %p610_p4, %p609_p3 }
  0x2d   :  { %v519_v27 = vpack.c.bf16 %v71_v24, %v70_v23  ;;  %v521_v28 = vpack.c.bf16 %v89_v26, %v88_v25  ;;  %v72_v29 = vld [vmem:[#allocation7 + $0x40] sm:$0xff]  ;;  %v73_v30 = vld [vmem:[#allocation7 + $0x48] sm:$0xff]  ;;  %v90_v31 = vld [vmem:[#allocation7 + $0xd0] sm:$0xff] }
  0x2e   :  { %v91_v32 = vld [vmem:[#allocation7 + $0xd8] sm:$0xff]  ;;  %v523_v33 = vpack.c.bf16 %v73_v30, %v72_v29  ;;  %v74_v35 = vld [vmem:[#allocation7 + $0x50] sm:$0xff]  ;;  %v92_v37 = vld [vmem:[#allocation7 + $0xe0] sm:$0xff]  ;;  %p612_p6 = pnand %p611_p5, %p605_p2 }
  0x2f   :  { %v525_v34 = vpack.c.bf16 %v91_v32, %v90_v31  ;;  %v75_v36 = vld [vmem:[#allocation7 + $0x58] sm:$0xff]  ;;  %v93_v38 = vld [vmem:[#allocation7 + $0xe8] sm:$0xff]  ;;  %v76_v41 = vld [vmem:[#allocation7 + $0x60] sm:$0xff] }
  0x30   :  { %v527_v39 = vpack.c.bf16 %v75_v36, %v74_v35  ;;  %v529_v40 = vpack.c.bf16 %v93_v38, %v92_v37  ;;  %v77_v42 = vld [vmem:[#allocation7 + $0x68] sm:$0xff]  ;;  %v94_v43 = vld [vmem:[#allocation7 + $0xf0] sm:$0xff]  ;;  %v95_v44 = vld [vmem:[#allocation7 + $0xf8] sm:$0xff] }
  0x31   :  { %v531_v45 = vpack.c.bf16 %v77_v42, %v76_v41  ;;  %v533_v46 = vpack.c.bf16 %v95_v44, %v94_v43  ;;  %v78_v47 = vld [vmem:[#allocation7 + $0x70] sm:$0xff]  ;;  %v79_v48 = vld [vmem:[#allocation7 + $0x78] sm:$0xff]  ;;  %v49_v50 = vld [vmem:[#allocation4 + $0x8] sm:$0xff] }
  0x32   :  { %512 = vmatpush3.bf16.xpose.msra.mxu0 %v511_v13  ;;  %546 = vmatpush3.bf16.xpose.msra.mxu1 %v511_v13  ;;  %v535_v49 = vpack.c.bf16 %v79_v48, %v78_v47  ;;  %v57_v51 = vld [vmem:[#allocation4 + $0x48] sm:$0xff]  ;;  %v50_v52 = vld [vmem:[#allocation4 + $0x10] sm:$0xff]  ;;  %v51_v54 = vld [vmem:[#allocation4 + $0x18] sm:$0xff] }
  0x33   :  { %514 = vmatprep.subr.bf16.mxu0 %v513_v14  ;;  %539 = vmatprep.subr.bf16.mxu1 %v513_v14  ;;  %v58_v53 = vld [vmem:[#allocation4 + $0x50] sm:$0xff]  ;;  %v59_v55 = vld [vmem:[#allocation4 + $0x58] sm:$0xff]  ;;  %v52_v56 = vld [vmem:[#allocation4 + $0x20] sm:$0xff] }
  0x34   :  { %v60_v57 = vld [vmem:[#allocation4 + $0x60] sm:$0xff]  ;;  %v53_v58 = vld [vmem:[#allocation4 + $0x28] sm:$0xff]  ;;  %v54_v60 = vld [vmem:[#allocation4 + $0x30] sm:$0xff] }
  0x35   :  { %v61_v59 = vld [vmem:[#allocation4 + $0x68] sm:$0xff]  ;;  %v62_v61 = vld [vmem:[#allocation4 + $0x70] sm:$0xff]  ;;  %v55_v62 = vld [vmem:[#allocation4 + $0x38] sm:$0xff] }
  0x36   :  { %v63_v63 = vld [vmem:[#allocation4 + $0x78] sm:$0xff] }
  0x3a   :  { %516 = vmatpush3.bf16.xpose.msra.mxu0 %v515_v21  ;;  %547 = vmatpush3.bf16.xpose.msra.mxu1 %v515_v21 }
  0x3b   :  { %518 = vmatprep.subr.bf16.mxu0 %v517_v22  ;;  %540 = vmatprep.subr.bf16.mxu1 %v517_v22 }
  0x42   :  { %520 = vmatpush3.bf16.xpose.msra.mxu0 %v519_v27  ;;  %548 = vmatpush3.bf16.xpose.msra.mxu1 %v519_v27 }
  0x43   :  { %522 = vmatprep.subr.bf16.mxu0 %v521_v28  ;;  %541 = vmatprep.subr.bf16.mxu1 %v521_v28 }
  0x4a   :  { %524 = vmatpush3.bf16.xpose.msra.mxu0 %v523_v33  ;;  %549 = vmatpush3.bf16.xpose.msra.mxu1 %v523_v33 }
  0x4b   :  { %526 = vmatprep.subr.bf16.mxu0 %v525_v34  ;;  %542 = vmatprep.subr.bf16.mxu1 %v525_v34 }
  0x52   :  { %528 = vmatpush3.bf16.xpose.msra.mxu0 %v527_v39  ;;  %550 = vmatpush3.bf16.xpose.msra.mxu1 %v527_v39 }
  0x53   :  { %530 = vmatprep.subr.bf16.mxu0 %v529_v40  ;;  %543 = vmatprep.subr.bf16.mxu1 %v529_v40 }
  0x5a   :  { %532 = vmatpush3.bf16.xpose.msra.mxu0 %v531_v45  ;;  %551 = vmatpush3.bf16.xpose.msra.mxu1 %v531_v45 }
  0x5b   :  { %534 = vmatprep.subr.bf16.mxu0 %v533_v46  ;;  %544 = vmatprep.subr.bf16.mxu1 %v533_v46 }
  0x62   :  { %536 = vmatpush3.bf16.xpose.msra.mxu0 %v535_v49  ;;  %552 = vmatpush3.bf16.xpose.msra.mxu1 %v535_v49 }
  0x69   :  { %474 = vmatmul.mubr.f32.vlgmr.msra.gmra.mrb[0].mxu0 %v688_v15  ;;  %490 = vmatmul.mubr.f32.vlgmr.msra.gmra.mrb[0].mxu1 %v691_v16 }
  0x6a   :  { %475 = vmatprep.mubr.f32.mxu0 %v49_v50  ;;  %491 = vmatprep.mubr.f32.mxu1 %v57_v51 }
  0x6d   :  { %476 = vmatmul.mubr.f32.gmra.mrb[2].mxu0 %v49_v50  ;;  %492 = vmatmul.mubr.f32.gmra.mrb[2].mxu1 %v57_v51 }
  0x6e   :  { %477 = vmatprep.mubr.f32.mxu0 %v50_v52  ;;  %493 = vmatprep.mubr.f32.mxu1 %v58_v53 }
  0x71   :  { %478 = vmatmul.mubr.f32.gmra.mrb[4].mxu0 %v50_v52  ;;  %494 = vmatmul.mubr.f32.gmra.mrb[4].mxu1 %v58_v53 }
  0x72   :  { %479 = vmatprep.mubr.f32.mxu0 %v51_v54  ;;  %495 = vmatprep.mubr.f32.mxu1 %v59_v55 }
  0x75   :  { %480 = vmatmul.mubr.f32.gmra.mrb[6].mxu0 %v51_v54  ;;  %496 = vmatmul.mubr.f32.gmra.mrb[6].mxu1 %v59_v55 }
  0x76   :  { %481 = vmatprep.mubr.f32.mxu0 %v52_v56  ;;  %497 = vmatprep.mubr.f32.mxu1 %v60_v57 }
  0x79   :  { %482 = vmatmul.mubr.f32.gmra.mrb[8].mxu0 %v52_v56  ;;  %498 = vmatmul.mubr.f32.gmra.mrb[8].mxu1 %v60_v57 }
  0x7a   :  { %483 = vmatprep.mubr.f32.mxu0 %v53_v58  ;;  %499 = vmatprep.mubr.f32.mxu1 %v61_v59 }
  0x7d   :  { %484 = vmatmul.mubr.f32.gmra.mrb[10].mxu0 %v53_v58  ;;  %500 = vmatmul.mubr.f32.gmra.mrb[10].mxu1 %v61_v59 }
  0x7e   :  { %485 = vmatprep.mubr.f32.mxu0 %v54_v60  ;;  %501 = vmatprep.mubr.f32.mxu1 %v62_v61 }
  0x81   :  { %486 = vmatmul.mubr.f32.gmra.mrb[12].mxu0 %v54_v60  ;;  %502 = vmatmul.mubr.f32.gmra.mrb[12].mxu1 %v62_v61 }
  0x82   :  { %487 = vmatprep.mubr.f32.mxu0 %v55_v62  ;;  %503 = vmatprep.mubr.f32.mxu1 %v63_v63 }
  0x85   :  { %488 = vmatmul.mubr.f32.gmra.mrb[14].mxu0 %v55_v62  ;;  %504 = vmatmul.mubr.f32.gmra.mrb[14].mxu1 %v63_v63 }
 0x13c   :  { %v162_v1 = vpop.f32.mrb[0].mxu0  ;;  %v210_v3 = vpop.f32.mrb[0].mxu1 }
 0x13d   :  { %v262_v4 = vmul.f32 %v704_v0, %v162_v1  ;;  %v278_v5 = vmul.f32 %v704_v0, %v210_v3  ;;  %v164_v6 = vpop.f32.mrb[1].mxu0  ;;  %v212_v7 = vpop.f32.mrb[1].mxu1 }
 0x13e   :  { %v263_v8 = vmul.f32 %v704_v0, %v164_v6  ;;  %v279_v9 = vmul.f32 %v704_v0, %v212_v7 }
 0x13f   :  { %v295_v10 = vadd.f32 %v706_v2, %v262_v4  ;;  %v311_v11 = vadd.f32 %v706_v2, %v278_v5 }
 0x140   :  { %v296_v12 = vadd.f32 %v706_v2, %v263_v8  ;;  %v312_v13 = vadd.f32 %v706_v2, %v279_v9  ;;  %v168_v14 = vpop.f32.mrb[2].mxu0  ;;  %v216_v15 = vpop.f32.mrb[2].mxu1 }
 0x141   :  { %v327_v16 = vmul.f32 %v295_v10, %v295_v10  ;;  %v343_v17 = vmul.f32 %v311_v11, %v311_v11  ;;  %v264_v18 = vmul.f32 %v704_v0, %v168_v14  ;;  %v280_v19 = vmul.f32 %v704_v0, %v216_v15  ;;  %v170_v20 = vpop.f32.mrb[3].mxu0  ;;  %v218_v21 = vpop.f32.mrb[3].mxu1 }
 0x142   :  { %v328_v22 = vmul.f32 %v296_v12, %v296_v12  ;;  %v344_v23 = vmul.f32 %v312_v13, %v312_v13  ;;  %v265_v24 = vmul.f32 %v704_v0, %v170_v20  ;;  %v281_v25 = vmul.f32 %v704_v0, %v218_v21 }
 0x143   :  { %v359_v26 = vmul.f32 %v327_v16, %v295_v10  ;;  %v375_v27 = vmul.f32 %v343_v17, %v311_v11  ;;  %v297_v28 = vadd.f32 %v706_v2, %v264_v18  ;;  %v313_v29 = vadd.f32 %v706_v2, %v280_v19 }
 0x144   :  { %v360_v30 = vmul.f32 %v328_v22, %v296_v12  ;;  %v376_v31 = vmul.f32 %v344_v23, %v312_v13  ;;  %v298_v32 = vadd.f32 %v706_v2, %v265_v24  ;;  %v314_v33 = vadd.f32 %v706_v2, %v281_v25  ;;  %v174_v34 = vpop.f32.mrb[4].mxu0  ;;  %v222_v35 = vpop.f32.mrb[4].mxu1 }
 0x145   :  { %391 = vst [vmem:[#allocation9] sm:$0xff] %v359_v26  ;;  %407 = vst [vmem:[#allocation9 + $0x80] sm:$0xff] %v375_v27  ;;  %v329_v36 = vmul.f32 %v297_v28, %v297_v28  ;;  %v345_v37 = vmul.f32 %v313_v29, %v313_v29  ;;  %v266_v38 = vmul.f32 %v704_v0, %v174_v34  ;;  %v176_v40 = vpop.f32.mrb[5].mxu0  ;;  %v224_v41 = vpop.f32.mrb[5].mxu1 }
 0x146   :  { %v282_v39 = vmul.f32 %v704_v0, %v222_v35  ;;  %392 = vst [vmem:[#allocation9 + $0x8] sm:$0xff] %v360_v30  ;;  %408 = vst [vmem:[#allocation9 + $0x88] sm:$0xff] %v376_v31  ;;  %v330_v42 = vmul.f32 %v298_v32, %v298_v32  ;;  %v346_v43 = vmul.f32 %v314_v33, %v314_v33 }
 0x147   :  { %v267_v44 = vmul.f32 %v704_v0, %v176_v40  ;;  %v283_v45 = vmul.f32 %v704_v0, %v224_v41  ;;  %v361_v46 = vmul.f32 %v329_v36, %v297_v28  ;;  %v377_v47 = vmul.f32 %v345_v37, %v313_v29 }
 0x148   :  { %v299_v48 = vadd.f32 %v706_v2, %v266_v38  ;;  %v315_v49 = vadd.f32 %v706_v2, %v282_v39  ;;  %v362_v50 = vmul.f32 %v330_v42, %v298_v32  ;;  %v378_v51 = vmul.f32 %v346_v43, %v314_v33  ;;  %v180_v54 = vpop.f32.mrb[6].mxu0  ;;  %v228_v55 = vpop.f32.mrb[6].mxu1 }
 0x149   :  { %v300_v52 = vadd.f32 %v706_v2, %v267_v44  ;;  %v316_v53 = vadd.f32 %v706_v2, %v283_v45  ;;  %393 = vst [vmem:[#allocation9 + $0x10] sm:$0xff] %v361_v46  ;;  %409 = vst [vmem:[#allocation9 + $0x90] sm:$0xff] %v377_v47  ;;  %v268_v58 = vmul.f32 %v704_v0, %v180_v54  ;;  %v182_v60 = vpop.f32.mrb[7].mxu0  ;;  %v230_v61 = vpop.f32.mrb[7].mxu1 }
 0x14a   :  { %v331_v56 = vmul.f32 %v299_v48, %v299_v48  ;;  %v347_v57 = vmul.f32 %v315_v49, %v315_v49  ;;  %v284_v59 = vmul.f32 %v704_v0, %v228_v55  ;;  %394 = vst [vmem:[#allocation9 + $0x18] sm:$0xff] %v362_v50  ;;  %410 = vst [vmem:[#allocation9 + $0x98] sm:$0xff] %v378_v51 }
 0x14b   :  { %v332_v62 = vmul.f32 %v300_v52, %v300_v52  ;;  %v348_v63 = vmul.f32 %v316_v53, %v316_v53  ;;  %v269_v1 = vmul.f32 %v704_v0, %v182_v60  ;;  %v285_v3 = vmul.f32 %v704_v0, %v230_v61 }
 0x14c   :  { %v363_v4 = vmul.f32 %v331_v56, %v299_v48  ;;  %v379_v5 = vmul.f32 %v347_v57, %v315_v49  ;;  %v301_v6 = vadd.f32 %v706_v2, %v268_v58  ;;  %v317_v7 = vadd.f32 %v706_v2, %v284_v59  ;;  %v186_v12 = vpop.f32.mrb[8].mxu0  ;;  %v234_v13 = vpop.f32.mrb[8].mxu1 }
 0x14d   :  { %v364_v8 = vmul.f32 %v332_v62, %v300_v52  ;;  %v380_v9 = vmul.f32 %v348_v63, %v316_v53  ;;  %v302_v10 = vadd.f32 %v706_v2, %v269_v1  ;;  %v318_v11 = vadd.f32 %v706_v2, %v285_v3  ;;  %v188_v18 = vpop.f32.mrb[9].mxu0  ;;  %v236_v19 = vpop.f32.mrb[9].mxu1 }
 0x14e   :  { %395 = vst [vmem:[#allocation9 + $0x20] sm:$0xff] %v363_v4  ;;  %411 = vst [vmem:[#allocation9 + $0xa0] sm:$0xff] %v379_v5  ;;  %v333_v14 = vmul.f32 %v301_v6, %v301_v6  ;;  %v349_v15 = vmul.f32 %v317_v7, %v317_v7  ;;  %v270_v16 = vmul.f32 %v704_v0, %v186_v12 }
 0x14f   :  { %v286_v17 = vmul.f32 %v704_v0, %v234_v13  ;;  %396 = vst [vmem:[#allocation9 + $0x28] sm:$0xff] %v364_v8  ;;  %412 = vst [vmem:[#allocation9 + $0xa8] sm:$0xff] %v380_v9  ;;  %v334_v20 = vmul.f32 %v302_v10, %v302_v10  ;;  %v350_v21 = vmul.f32 %v318_v11, %v318_v11 }
 0x150   :  { %v271_v22 = vmul.f32 %v704_v0, %v188_v18  ;;  %v287_v23 = vmul.f32 %v704_v0, %v236_v19  ;;  %v365_v24 = vmul.f32 %v333_v14, %v301_v6  ;;  %v381_v25 = vmul.f32 %v349_v15, %v317_v7  ;;  %v192_v32 = vpop.f32.mrb[10].mxu0  ;;  %v240_v33 = vpop.f32.mrb[10].mxu1 }
 0x151   :  { %v303_v26 = vadd.f32 %v706_v2, %v270_v16  ;;  %v319_v27 = vadd.f32 %v706_v2, %v286_v17  ;;  %v366_v28 = vmul.f32 %v334_v20, %v302_v10  ;;  %v382_v29 = vmul.f32 %v350_v21, %v318_v11  ;;  %v194_v38 = vpop.f32.mrb[11].mxu0  ;;  %v242_v39 = vpop.f32.mrb[11].mxu1 }
 0x152   :  { %v304_v30 = vadd.f32 %v706_v2, %v271_v22  ;;  %v320_v31 = vadd.f32 %v706_v2, %v287_v23  ;;  %397 = vst [vmem:[#allocation9 + $0x30] sm:$0xff] %v365_v24  ;;  %413 = vst [vmem:[#allocation9 + $0xb0] sm:$0xff] %v381_v25  ;;  %v272_v36 = vmul.f32 %v704_v0, %v192_v32 }
 0x153   :  { %v335_v34 = vmul.f32 %v303_v26, %v303_v26  ;;  %v351_v35 = vmul.f32 %v319_v27, %v319_v27  ;;  %v288_v37 = vmul.f32 %v704_v0, %v240_v33  ;;  %398 = vst [vmem:[#allocation9 + $0x38] sm:$0xff] %v366_v28  ;;  %414 = vst [vmem:[#allocation9 + $0xb8] sm:$0xff] %v382_v29 }
 0x154   :  { %v336_v40 = vmul.f32 %v304_v30, %v304_v30  ;;  %v352_v41 = vmul.f32 %v320_v31, %v320_v31  ;;  %v273_v42 = vmul.f32 %v704_v0, %v194_v38  ;;  %v289_v43 = vmul.f32 %v704_v0, %v242_v39  ;;  %v198_v52 = vpop.f32.mrb[12].mxu0  ;;  %v246_v53 = vpop.f32.mrb[12].mxu1 }
 0x155   :  { %v367_v44 = vmul.f32 %v335_v34, %v303_v26  ;;  %v383_v45 = vmul.f32 %v351_v35, %v319_v27  ;;  %v305_v46 = vadd.f32 %v706_v2, %v272_v36  ;;  %v321_v47 = vadd.f32 %v706_v2, %v288_v37  ;;  %v200_v58 = vpop.f32.mrb[13].mxu0  ;;  %v248_v59 = vpop.f32.mrb[13].mxu1 }
 0x156   :  { %v368_v48 = vmul.f32 %v336_v40, %v304_v30  ;;  %v384_v49 = vmul.f32 %v352_v41, %v320_v31  ;;  %v306_v50 = vadd.f32 %v706_v2, %v273_v42  ;;  %v322_v51 = vadd.f32 %v706_v2, %v289_v43 }
 0x157   :  { %399 = vst [vmem:[#allocation9 + $0x40] sm:$0xff] %v367_v44  ;;  %415 = vst [vmem:[#allocation9 + $0xc0] sm:$0xff] %v383_v45  ;;  %v337_v54 = vmul.f32 %v305_v46, %v305_v46  ;;  %v353_v55 = vmul.f32 %v321_v47, %v321_v47  ;;  %v274_v56 = vmul.f32 %v704_v0, %v198_v52 }
 0x158   :  { %v290_v57 = vmul.f32 %v704_v0, %v246_v53  ;;  %400 = vst [vmem:[#allocation9 + $0x48] sm:$0xff] %v368_v48  ;;  %416 = vst [vmem:[#allocation9 + $0xc8] sm:$0xff] %v384_v49  ;;  %v338_v60 = vmul.f32 %v306_v50, %v306_v50  ;;  %v354_v61 = vmul.f32 %v322_v51, %v322_v51  ;;  %v204_v10 = vpop.f32.mrb[14].mxu0  ;;  %v252_v11 = vpop.f32.mrb[14].mxu1 }
 0x159   :  { %v275_v62 = vmul.f32 %v704_v0, %v200_v58  ;;  %v291_v63 = vmul.f32 %v704_v0, %v248_v59  ;;  %v369_v1 = vmul.f32 %v337_v54, %v305_v46  ;;  %v385_v3 = vmul.f32 %v353_v55, %v321_v47  ;;  %v206_v16 = vpop.f32.mrb[15].mxu0  ;;  %v254_v17 = vpop.f32.mrb[15].mxu1 }
 0x15a   :  { %v307_v4 = vadd.f32 %v706_v2, %v274_v56  ;;  %v323_v5 = vadd.f32 %v706_v2, %v290_v57  ;;  %v370_v6 = vmul.f32 %v338_v60, %v306_v50  ;;  %v386_v7 = vmul.f32 %v354_v61, %v322_v51 }
 0x15b   :  { %v308_v8 = vadd.f32 %v706_v2, %v275_v62  ;;  %v324_v9 = vadd.f32 %v706_v2, %v291_v63  ;;  %401 = vst [vmem:[#allocation9 + $0x50] sm:$0xff] %v369_v1  ;;  %417 = vst [vmem:[#allocation9 + $0xd0] sm:$0xff] %v385_v3  ;;  %v276_v14 = vmul.f32 %v704_v0, %v204_v10 }
 0x15c   :  { %v339_v12 = vmul.f32 %v307_v4, %v307_v4  ;;  %v355_v13 = vmul.f32 %v323_v5, %v323_v5  ;;  %v292_v15 = vmul.f32 %v704_v0, %v252_v11  ;;  %402 = vst [vmem:[#allocation9 + $0x58] sm:$0xff] %v370_v6  ;;  %418 = vst [vmem:[#allocation9 + $0xd8] sm:$0xff] %v386_v7 }
 0x15d   :  { %v340_v18 = vmul.f32 %v308_v8, %v308_v8  ;;  %v356_v19 = vmul.f32 %v324_v9, %v324_v9  ;;  %v277_v20 = vmul.f32 %v704_v0, %v206_v16  ;;  %v293_v21 = vmul.f32 %v704_v0, %v254_v17 }
 0x15e   :  { %v371_v22 = vmul.f32 %v339_v12, %v307_v4  ;;  %v387_v23 = vmul.f32 %v355_v13, %v323_v5  ;;  %v309_v24 = vadd.f32 %v706_v2, %v276_v14  ;;  %v325_v25 = vadd.f32 %v706_v2, %v292_v15 }
 0x15f   :  { %v372_v26 = vmul.f32 %v340_v18, %v308_v8  ;;  %v388_v27 = vmul.f32 %v356_v19, %v324_v9  ;;  %v310_v28 = vadd.f32 %v706_v2, %v277_v20  ;;  %v326_v29 = vadd.f32 %v706_v2, %v293_v21 }
 0x160   :  { %403 = vst [vmem:[#allocation9 + $0x60] sm:$0xff] %v371_v22  ;;  %419 = vst [vmem:[#allocation9 + $0xe0] sm:$0xff] %v387_v23  ;;  %v341_v30 = vmul.f32 %v309_v24, %v309_v24  ;;  %v357_v31 = vmul.f32 %v325_v25, %v325_v25 }
 0x161   :  { %404 = vst [vmem:[#allocation9 + $0x68] sm:$0xff] %v372_v26  ;;  %420 = vst [vmem:[#allocation9 + $0xe8] sm:$0xff] %v388_v27  ;;  %v342_v0 = vmul.f32 %v310_v28, %v310_v28  ;;  %v358_v32 = vmul.f32 %v326_v29, %v326_v29 }
 0x162   :  { %v373_v33 = vmul.f32 %v341_v30, %v309_v24  ;;  %v389_v34 = vmul.f32 %v357_v31, %v325_v25 }
 0x163   :  { %v374_v35 = vmul.f32 %v342_v0, %v310_v28  ;;  %v390_v36 = vmul.f32 %v358_v32, %v326_v29 }
 0x164   :  { %405 = vst [vmem:[#allocation9 + $0x70] sm:$0xff] %v373_v33  ;;  %421 = vst [vmem:[#allocation9 + $0xf0] sm:$0xff] %v389_v34 }
 0x165   :  { %406 = vst [vmem:[#allocation9 + $0x78] sm:$0xff] %v374_v35  ;;  %422 = vst [vmem:[#allocation9 + $0xf8] sm:$0xff] %v390_v36 }
 0x166   :  { %615 = shalt.err (!%p612_p6)
}
 0x167   :  { %s616_s22 = scalar_lea.hbm %s788_s4, 4096 }
 0x168   :  { %p617_p7 = scmp.ne.s32.totalorder %s788_s4, %s616_s22  ;;  %p620_p8 = scmp.lt.u32.totalorder %s616_s22, %s788_s4 }
 0x16a   :  { %p622_p9 = pnand %p620_p8, %p617_p7 }
 0x16c   :  { %625 = shalt.err (!%p622_p9)
}
 0x16d   :  { %s637_s27 = smov 256   ;;  %s638_s28 = smov 16  }
 0x16e   :  { %434 = dma.vmem_to_hbm [thread:$0]  %s429_s1, 4096, %s788_s4, [#allocation6], %s637_s27, %s637_s27, %s638_s28  }
 0x16f   :  { %630 = dma.done.wait [#allocation6], 4096  }
 0x170   :  { %631 = vsyncadd [#allocation6], 4294963200 }
 0x171   :  { %438 = vsyncpa [#allocation5], 1 }
 0x172   :  { %439 = vsyncpa [#allocation8], 1 }
 0x173   :  { %440 = vsyncpa [#allocation6], 1 }

</bundles_post_ra>
